<compile_context>
chip_gen: v6e
topology: v6e:2x2x1
jax: 0.10.0
libtpu: 0.0.40
codegen_flags: <defaults>
</compile_context>

<pallas_src>
import functools

import jax
import jax.numpy as jnp
from jax.experimental import pallas as pl
from jax.experimental.pallas import tpu as pltpu

_LANE = 128


def _copy_split_kernel(back_in_ref, fore_in_ref, back_ref, fore_ref):
    # Column split already performed by the BlockSpec DMAs: pure streaming copy.
    back_ref[...] = back_in_ref[...]
    fore_ref[...] = fore_in_ref[...]


def _slice_split_kernel(theta_ref, back_ref, fore_ref, *,
                        fore_off, backcast_size, forecast_size):
    # Slice the *ref* (view), never a materialized full tile: only the needed
    # columns are loaded, and static lane-aligned offsets lower to unmasked
    # vld/vst with no XLU rotates on the aligned path.
    back_ref[...] = theta_ref[:, :backcast_size]
    fore_ref[...] = theta_ref[:, fore_off:fore_off + forecast_size]


def _sublane_multiple(dtype) -> int:
    # f32 -> 8, bf16 -> 16, int8/fp8 -> 32
    return max(8, 32 // jnp.dtype(dtype).itemsize)


def _vmem_capacity_bytes() -> int:
    try:
        info = pltpu.get_tpu_info()
        return int(getattr(info, "vmem_capacity_bytes", 64 << 20))
    except Exception:
        return 64 << 20  # conservative (v7x per-TC VMEM)


def _pick_block_rows(batch, in_row_bytes, dtype, block_rows=None):
    sub = _sublane_multiple(dtype)
    if batch <= sub:
        # Full-extent sublane dim (equals array dim) satisfies the tiling rule.
        return batch
    if block_rows is not None:
        # Respect the user's hint but enforce the dtype sublane packing rule.
        tb = min(int(block_rows), batch)
        if tb != batch:
            tb = max(sub, ((tb + sub - 1) // sub) * sub)
            tb = min(tb, max(sub, (batch // sub) * sub))
        return tb
    # Bytes-per-step target: ~1/16 of VMEM per input block (>= 2 MiB) keeps the
    # mem-bound copy near the HBM roofline without pressuring scoped VMEM.
    target = max(2 << 20, _vmem_capacity_bytes() // 16)
    tb = target // max(in_row_bytes, 1)
    tb = max(sub, (tb // sub) * sub)
    tb = min(tb, max(sub, (batch // sub) * sub))
    # Keep at least 2 grid tiles so a v7x megacore can shard the batch axis.
    if batch >= 2 * sub and pl.cdiv(batch, tb) < 2:
        tb = max(sub, (((batch + 1) // 2) // sub) * sub)
    return tb


def _make_generic_basis(backcast_size: int, forecast_size: int, block_rows=None):
    """Return theta -> (backcast, forecast) backed by a Pallas TPU kernel."""

    def apply(theta: jax.Array):
        batch, theta_dim = theta.shape
        assert 0 < backcast_size <= theta_dim
        assert 0 < forecast_size <= theta_dim
        # If theta_dim < backcast_size + forecast_size the two outputs overlap,
        # exactly like the PyTorch slices.
        dtype = theta.dtype
        itemsize = jnp.dtype(dtype).itemsize
        fore_off = theta_dim - forecast_size

        lane_aligned = (backcast_size % _LANE == 0
                        and forecast_size % _LANE == 0
                        and fore_off % _LANE == 0)
        dma_split_ok = (lane_aligned
                        and forecast_size > 0
                        and fore_off % forecast_size == 0)

        # Bytes actually DMA'd in per batch row on each path.
        if dma_split_ok:
            in_row_bytes = (backcast_size + forecast_size) * itemsize
        else:
            in_row_bytes = theta_dim * itemsize
        out_row_bytes = (backcast_size + forecast_size) * itemsize

        tb = _pick_block_rows(batch, in_row_bytes, dtype, block_rows)
        grid = (pl.cdiv(batch, tb),)

        # Double-buffered (in + out) block footprint + headroom, v7x-safe cap.
        db_bytes = 2 * tb * (in_row_bytes + out_row_bytes)
        vmem_limit = int(min(max(db_bytes + (8 << 20), 32 << 20), 48 << 20))

        params = pltpu.CompilerParams(
            dimension_semantics=("parallel",),
            vmem_limit_bytes=vmem_limit,
        )
        cost = pl.CostEstimate(
            flops=0,
            transcendentals=0,
            bytes_accessed=batch * (in_row_bytes + out_row_bytes),
        )

        out_shape = (
            jax.ShapeDtypeStruct((batch, backcast_size), dtype),
            jax.ShapeDtypeStruct((batch, forecast_size), dtype),
        )
        out_specs = (
            pl.BlockSpec((tb, backcast_size), lambda i: (i, 0)),
            pl.BlockSpec((tb, forecast_size), lambda i: (i, 0)),
        )

        if dma_split_ok:
            # Column split expressed purely via BlockSpecs; kernel is a copy.
            fore_col_block = fore_off // forecast_size
            return pl.pallas_call(
                _copy_split_kernel,
                out_shape=out_shape,
                grid=grid,
                in_specs=[
                    pl.BlockSpec((tb, backcast_size), lambda i: (i, 0)),
                    pl.BlockSpec((tb, forecast_size),
                                 lambda i: (i, fore_col_block)),
                ],
                out_specs=out_specs,
                compiler_params=params,
                cost_estimate=cost,
            )(theta, theta)

        # Paths B/C: full-width theta block (last dim == full array dim
        # satisfies the tiling rule) + static ref-view slices in the kernel.
        kernel = functools.partial(
            _slice_split_kernel,
            fore_off=fore_off,
            backcast_size=backcast_size,
            forecast_size=forecast_size,
        )
        return pl.pallas_call(
            kernel,
            out_shape=out_shape,
            grid=grid,
            in_specs=[pl.BlockSpec((tb, theta_dim), lambda i: (i, 0))],
            out_specs=out_specs,
            compiler_params=params,
            cost_estimate=cost,
        )(theta)

    return apply


if __name__ == "__main__":
    key = jax.random.PRNGKey(0)
    k1, k2, k3 = jax.random.split(key, 3)

    # Case 1: small, lane-misaligned sizes -> general ref-slice fallback path.
    batch1, back1, fore1 = 2, 16, 8
    theta1 = jax.random.normal(k1, (batch1, back1 + fore1), dtype=jnp.float32)
    b1, f1 = _make_generic_basis(back1, fore1)(theta1)
    jax.block_until_ready((b1, f1))
    assert b1.shape == (batch1, back1) and f1.shape == (batch1, fore1)
    assert jnp.array_equal(b1, theta1[:, :back1])
    assert jnp.array_equal(f1, theta1[:, -fore1:])

    # Case 2: lane-aligned, forecast offset a multiple of forecast width
    # -> pure BlockSpec/DMA column split, multi-tile "parallel" grid.
    batch2, back2, fore2 = 16, 256, 128
    theta2 = jax.random.normal(k2, (batch2, back2 + fore2), dtype=jnp.float32)
    b2, f2 = _make_generic_basis(back2, fore2)(theta2)
    jax.block_until_ready((b2, f2))
    assert jnp.array_equal(b2, theta2[:, :back2])
    assert jnp.array_equal(f2, theta2[:, -fore2:])

    # Case 3: lane-aligned but offset (384) not a multiple of forecast (256)
    # -> lane-aligned ref-slice path (unmasked stores, no rotates).
    batch3, back3, fore3 = 16, 384, 256
    theta3 = jax.random.normal(k3, (batch3, back3 + fore3), dtype=jnp.float32)
    b3, f3 = _make_generic_basis(back3, fore3)(theta3)
    jax.block_until_ready((b3, f3))
    assert jnp.array_equal(b3, theta3[:, :back3])
    assert jnp.array_equal(f3, theta3[:, -fore3:])

    # Explicit block_rows hint is honored but rounded to the sublane multiple.
    b2b, f2b = _make_generic_basis(back2, fore2, block_rows=7)(theta2)
    jax.block_until_ready((b2b, f2b))
    assert jnp.array_equal(b2b, theta2[:, :back2])
    assert jnp.array_equal(f2b, theta2[:, -fore2:])

    print("KERNEL_OK")
</pallas_src>

<mosaic_0001>
module attributes {stable_mosaic.version = 11 : i64} {
  func.func @_slice_split_kernel(%arg0: i32, %arg1: memref<2x24xf32, #tpu.memory_space<vmem>>, %arg2: memref<2x16xf32, #tpu.memory_space<vmem>>, %arg3: memref<2x8xf32, #tpu.memory_space<vmem>>) attributes {dimension_semantics = [#tpu.dimension_semantics<parallel>], iteration_bounds = array<i64: 1>, scalar_prefetch = 0 : i64, scratch_operands = 0 : i64, tpu.core_type = #tpu.core_type<tc>, window_params = [{transform_indices = @transform_0, window_bounds = array<i64: 2, 24>}, {transform_indices = @transform_1, window_bounds = array<i64: 2, 16>}, {transform_indices = @transform_2, window_bounds = array<i64: 2, 8>}]} {
    %c0 = arith.constant 0 : index
    %c0_0 = arith.constant 0 : index
    %0 = vector.load %arg1[%c0, %c0_0] : memref<2x24xf32, #tpu.memory_space<vmem>>, vector<2x16xf32>
    %c0_1 = arith.constant 0 : index
    %c0_2 = arith.constant 0 : index
    %1 = vector.load %arg2[%c0_1, %c0_2] : memref<2x16xf32, #tpu.memory_space<vmem>>, vector<2x16xf32>
    tpu.vector_store %arg2[%c0_1, %c0_2], %0 {strides = array<i32>} : memref<2x16xf32, #tpu.memory_space<vmem>>, vector<2x16xf32>,
    %c0_3 = arith.constant 0 : index
    %c16 = arith.constant 16 : index
    %2 = vector.load %arg1[%c0_3, %c16] : memref<2x24xf32, #tpu.memory_space<vmem>>, vector<2x8xf32>
    %c0_4 = arith.constant 0 : index
    %c0_5 = arith.constant 0 : index
    %3 = vector.load %arg3[%c0_4, %c0_5] : memref<2x8xf32, #tpu.memory_space<vmem>>, vector<2x8xf32>
    tpu.vector_store %arg3[%c0_4, %c0_5], %2 {strides = array<i32>} : memref<2x8xf32, #tpu.memory_space<vmem>>, vector<2x8xf32>,
    return
  }
  func.func @transform_0(%arg0: i32) -> (i32, i32) {
    %c0_i32 = arith.constant 0 : i32
    %c0_i32_0 = arith.constant 0 : i32
    return %arg0, %c0_i32 : i32, i32
  }
  func.func @transform_1(%arg0: i32) -> (i32, i32) {
    %c0_i32 = arith.constant 0 : i32
    %c0_i32_0 = arith.constant 0 : i32
    return %arg0, %c0_i32 : i32, i32
  }
  func.func @transform_2(%arg0: i32) -> (i32, i32) {
    %c0_i32 = arith.constant 0 : i32
    %c0_i32_0 = arith.constant 0 : i32
    return %arg0, %c0_i32 : i32, i32
  }
}

</mosaic_0001>

<bundles_post_ra>
// kernel: tpu_custom_call.1
= control target key start
LH: loop header
LB: loop body
LE: loop exit
PB: predicated region body
PF: predicated region fallthrough
CT: control target
= control target key end

     0   :  { %8 = vsyncpa [#allocation3], 0  ;;  %s161_s0 = inlined_call_operand.hbm [shape: f32[2,24], index: 0, kind: input, shape index: {}]   ;;  %s162_s1 = inlined_call_operand.hbm [shape: f32[2,16], index: 1, kind: output, shape index: {0}]   ;;  %s163_s2 = inlined_call_operand.hbm [shape: f32[2,8], index: 2, kind: output, shape index: {1}]  }
   0x1   :  { %9 = vsyncpa [#allocation4], 0 }
   0x2   :  { %10 = vsyncpa [#allocation7], 0  ;;  %s133_s9 = smov [#allocation2]  }
   0x3   :  { %s17_s10 = sshll.u32 %s133_s9, 4  ;;  %s18_s10 = int_to_ptr.vmem [resolvable:$true] %s17_s10 }
   0x4   :  { %s75_s11 = scalar_lea.vmem %s18_s10, 32  ;;  %p80_p1 = scmp.lt.s32.totalorder %s18_s10, %s18_s10 }
   0x5   :  { %p76_p0 = scmp.ne.s32.totalorder %s18_s10, %s75_s11  ;;  %p81_p2 = scmp.lt.s32.totalorder %s75_s11, %s75_s11 }
   0x7   :  { %p82_p3 = por %p81_p2, %p80_p1 }
   0x9   :  { %p83_p4 = pnand %p82_p3, %p76_p0 }
   0xb   :  { %86 = shalt.err (!%p83_p4)
}
   0xc   :  { %20 = dma.hbm_to_vmem [thread:$0]  %s161_s0, 32, %s18_s10, [#allocation3]  }
   0xd   :  { %127 = dma.done.wait [#allocation3], 32  }
   0xe   :  { %128 = vsyncadd [#allocation3], 4294967264  ;;  %s134_s14 = smov [#allocation5]   ;;  %vm25_vm0 = vcmask 123904   ;;  %v27_v0 = vld [vmem:[#allocation2] sm:$0x3] }
   0xf   :  { %s40_s15 = sshll.u32 %s134_s14, 4  ;;  %v24_v1 = vld [vmem:[#allocation2] sm:$0x3]  ;;  %s135_s16 = smov 112   ;;  %s41_s15 = int_to_ptr.vmem [resolvable:$true] %s40_s15 }
  0x10   :  { %29 = vrot.lane.b32.xlu0 %v27_v0, %s135_s16  ;;  %26 = vst.msk [vmem:[#allocation5] sm:$0x3] %vm25_vm0, %v24_v1  ;;  %s87_s17 = scalar_lea.vmem %s41_s15, 32  ;;  %p92_p6 = scmp.lt.s32.totalorder %s41_s15, %s41_s15 }
  0x11   :  { %p88_p5 = scmp.ne.s32.totalorder %s41_s15, %s87_s17  ;;  %p93_p7 = scmp.lt.s32.totalorder %s87_s17, %s87_s17 }
  0x13   :  { %p94_p8 = por %p93_p7, %p92_p6 }
  0x15   :  { %p95_p9 = pnand %p94_p8, %p88_p5 }
  0x17   :  { %98 = shalt.err (!%p95_p9)
}
  0x18   :  { %43 = dma.vmem_to_hbm [thread:$0]  %s41_s15, 32, %s162_s1, [#allocation4]   ;;  %vm32_vm1 = vcmask 58368  }
  0x19   :  { %s136_s19 = smov [#allocation6]  }
  0x1a   :  { %s50_s20 = sshll.u32 %s136_s19, 4  ;;  %s51_s20 = int_to_ptr.vmem [resolvable:$true] %s50_s20 }
  0x1b   :  { %s107_s21 = scalar_lea.vmem %s51_s20, 32  ;;  %p112_p11 = scmp.lt.s32.totalorder %s51_s20, %s51_s20 }
  0x1c   :  { %p108_p10 = scmp.ne.s32.totalorder %s51_s20, %s107_s21  ;;  %p113_p12 = scmp.lt.s32.totalorder %s107_s21, %s107_s21 }
  0x1e   :  { %p114_p13 = por %p113_p12, %p112_p11 }
  0x20   :  { %p115_p0 = pnand %p114_p13, %p108_p10 }
  0x82   :  { %v30_v2 = vpop.permute.xlu0 %29 }
  0x83   :  { %33 = vst.msk [vmem:[#allocation6] sm:$0x3] %vm32_vm1, %v30_v2 }
  0x84   :  { %118 = shalt.err (!%p115_p0)
}
  0x85   :  { %53 = dma.vmem_to_hbm [thread:$0]  %s51_s20, 32, %s163_s2, [#allocation7]  }
  0x86   :  { %129 = dma.done.wait [#allocation4], 32  }
  0x87   :  { %130 = vsyncadd [#allocation4], 4294967264 }
  0x88   :  { %131 = dma.done.wait [#allocation7], 32  }
  0x89   :  { %132 = vsyncadd [#allocation7], 4294967264 }
  0x8a   :  { %60 = vsyncpa [#allocation3], 1 }
  0x8b   :  { %61 = vsyncpa [#allocation4], 1 }
  0x8c   :  { %62 = vsyncpa [#allocation7], 1 }

</bundles_post_ra>
